<compile_context>
chip_gen: v7x
topology: tpu7x:2x2x1
jax: 0.10.0
libtpu: 0.0.40
codegen_flags: <defaults>
</compile_context>

<pallas_src>
import jax
import jax.numpy as jnp
from jax.experimental import pallas as pl
from jax.experimental.pallas import tpu as pltpu

_MiB = 1024 * 1024
# Expanded w1 (repeat(w1, T)/T) stays VMEM-resident only if it is small; above
# this the fused path would compete with the x double-buffer for VMEM (v7x).
_W1_EXPAND_LIMIT_BYTES = 4 * _MiB


# ---------------------------------------------------------------------------
# Kernels
# ---------------------------------------------------------------------------

def _attention_kernel_fused(x_ref, w1_ref, b1_ref, w2_ref, b2_ref, out_ref):
    """Fused path: mean over T folded into w1 (w1e = repeat(w1, T, axis=0) / T).

    x_ref : (TB, C*T) VMEM   -- flattened x block, native dtype (no upcast)
    w1_ref: (C*T, H)  VMEM   -- resident across grid steps
    b1_ref: (1, H)    VMEM
    w2_ref: (1, H)    VMEM   -- second Linear weight as a row
    b2_ref: (1, 1)    SMEM   -- scalar bias
    out_ref: (TB, 1)  VMEM
    """
    # Linear(C -> H) + mean-over-T (folded into w1e) + ReLU.  x stays in its
    # native dtype: the MXU consumes it directly and accumulates in f32.
    h = jnp.dot(x_ref[...], w1_ref[...],
                preferred_element_type=jnp.float32) + b1_ref[...]
    h = jnp.maximum(h, 0.0)                                       # (TB, H) f32

    # Linear(H -> 1) on the VPU: multiply + row reduce (skip an N=1 MXU pass).
    z = jnp.sum(h * w2_ref[...], axis=-1, keepdims=True) + b2_ref[0, 0]

    # Exact sigmoid; z is only (TB, 1) so the divide cost is negligible.
    out_ref[...] = (1.0 / (1.0 + jnp.exp(-z))).astype(out_ref.dtype)


def _attention_kernel_mean(x_ref, w1_ref, b1_ref, w2_ref, b2_ref, out_ref):
    """Fallback path for large C*T*H: mean over T in-kernel, original (C, H) w1.

    x_ref : (TB, C, T) VMEM, w1_ref: (C, H) VMEM, rest as in the fused kernel.
    """
    xm = jnp.mean(x_ref[...].astype(jnp.float32), axis=-1)        # (TB, C)
    h = jnp.dot(xm, w1_ref[...], preferred_element_type=jnp.float32) + b1_ref[...]
    h = jnp.maximum(h, 0.0)
    z = jnp.sum(h * w2_ref[...], axis=-1, keepdims=True) + b2_ref[0, 0]
    out_ref[...] = (1.0 / (1.0 + jnp.exp(-z))).astype(out_ref.dtype)


# ---------------------------------------------------------------------------
# Tiling helpers
# ---------------------------------------------------------------------------

def _vmem_budget():
    """Return (per-x-buffer byte cap, vmem_limit_bytes) per TPU generation."""
    try:
        cap = pltpu.get_tpu_info().vmem_capacity_bytes
    except Exception:
        cap = 64 * _MiB                            # conservative: v7x per-TC VMEM
    if cap >= 100 * _MiB:                          # v5e / v6e: 128 MiB VMEM
        return 16 * _MiB, 80 * _MiB
    # v7x: 64 MiB/TC -- 2 x 12 MiB double-buffered x + weights + headroom < 48 MiB
    return 12 * _MiB, 48 * _MiB


def _pick_batch_tile(batch, row_bytes, per_buf_bytes):
    """Largest batch tile s.t. (a) the double-buffered x block fits the VMEM
    budget and (b) the grid has >= 2 steps whenever possible, so the 'parallel'
    batch axis actually shards across both v7x TensorCores."""
    max_rows_vmem = max(8, per_buf_bytes // max(row_bytes, 1))
    two_step_rows = max(8, ((pl.cdiv(batch, 2) + 7) // 8) * 8)   # ceil(B/2) -> x8
    tb = min(max_rows_vmem, two_step_rows)
    tb = max(8, (tb // 8) * 8)
    return min(batch, tb)


# ---------------------------------------------------------------------------
# Wrapper
# ---------------------------------------------------------------------------

def attention_module(x, w1, b1, w2, b2):
    """x: (B, C, T) float -> scores (B, 1) float32.

    Matches torch: Sigmoid(Linear(H, 1)(ReLU(Linear(C, H)(x.mean(2))))).
    w1: (C, H), b1: (1, H), w2: (H, 1), b2: (1, 1)  (torch weights transposed).
    """
    B, C, T = x.shape
    H = w1.shape[1]
    kdim = C * T

    b1r = b1.reshape(1, H).astype(jnp.float32)
    w2r = w2.reshape(1, H).astype(jnp.float32)          # row vector for VPU reduce
    b2s = b2.reshape(1, 1).astype(jnp.float32)          # SMEM scalar

    per_buf_bytes, vmem_limit = _vmem_budget()
    compiler_params = pltpu.CompilerParams(
        dimension_semantics=("parallel",),               # batch axis across TCs
        vmem_limit_bytes=vmem_limit,
    )
    tb = _pick_batch_tile(B, kdim * x.dtype.itemsize, per_buf_bytes)
    grid = (pl.cdiv(B, tb),)

    if kdim * H * 4 <= _W1_EXPAND_LIMIT_BYTES:
        # Fused mean:  mean_t(x) @ w1 == reshape(x, (B, C*T)) @ (repeat(w1, T)/T)
        w_dtype = x.dtype if x.dtype == jnp.bfloat16 else jnp.float32
        w1e = (jnp.repeat(w1.astype(jnp.float32), T, axis=0)
               / jnp.float32(T)).astype(w_dtype)                        # (C*T, H)
        x2d = x.reshape(B, kdim)                                        # free flatten
        grid_spec = pltpu.PrefetchScalarGridSpec(
            num_scalar_prefetch=0,
            grid=grid,
            in_specs=[
                # x block streams along the batch axis (double-buffered DMA).
                pl.BlockSpec((tb, kdim), lambda i: (i, 0)),
                # Weights / biases: same block every step -> VMEM-resident.
                pl.BlockSpec((kdim, H), lambda i: (0, 0)),
                pl.BlockSpec((1, H), lambda i: (0, 0)),
                pl.BlockSpec((1, H), lambda i: (0, 0)),
                # Scalar bias in SMEM (no padded VMEM tile / extra DMA).
                pl.BlockSpec(memory_space=pltpu.MemorySpace.SMEM),
            ],
            out_specs=pl.BlockSpec((tb, 1), lambda i: (i, 0)),
        )
        return pl.pallas_call(
            _attention_kernel_fused,
            out_shape=jax.ShapeDtypeStruct((B, 1), jnp.float32),
            grid_spec=grid_spec,
            compiler_params=compiler_params,
        )(x2d, w1e, b1r, w2r, b2s)

    # Fallback: large C*T*H -- keep w1 at (C, H); mean over T done in-kernel so
    # the resident weight never competes with the x double-buffer for VMEM.
    grid_spec = pltpu.PrefetchScalarGridSpec(
        num_scalar_prefetch=0,
        grid=grid,
        in_specs=[
            pl.BlockSpec((tb, C, T), lambda i: (i, 0, 0)),
            pl.BlockSpec((C, H), lambda i: (0, 0)),
            pl.BlockSpec((1, H), lambda i: (0, 0)),
            pl.BlockSpec((1, H), lambda i: (0, 0)),
            pl.BlockSpec(memory_space=pltpu.MemorySpace.SMEM),
        ],
        out_specs=pl.BlockSpec((tb, 1), lambda i: (i, 0)),
    )
    return pl.pallas_call(
        _attention_kernel_mean,
        out_shape=jax.ShapeDtypeStruct((B, 1), jnp.float32),
        grid_spec=grid_spec,
        compiler_params=compiler_params,
    )(x, w1.astype(jnp.float32), b1r, w2r, b2s)


def reference(x, w1, b1, w2, b2):
    xm = jnp.mean(x, axis=2)
    h = jnp.maximum(xm @ w1 + b1, 0.0)
    return jax.nn.sigmoid(h @ w2 + b2)


if __name__ == "__main__":
    # Small shapes consistent with the module: in_channels=16, hidden_dim=32.
    B, C, T, H = 2, 16, 8, 32   # batch, in_channels, temporal, hidden_dim

    key = jax.random.PRNGKey(0)
    kx, kw1, kb1, kw2, kb2 = jax.random.split(key, 5)

    x = jax.random.normal(kx, (B, C, T), dtype=jnp.float32)

    # PyTorch-style uniform(-1/sqrt(fan_in), 1/sqrt(fan_in)) init.
    lim1 = 1.0 / jnp.sqrt(jnp.float32(C))
    w1 = jax.random.uniform(kw1, (C, H), jnp.float32, -lim1, lim1)
    b1 = jax.random.uniform(kb1, (1, H), jnp.float32, -lim1, lim1)
    lim2 = 1.0 / jnp.sqrt(jnp.float32(H))
    w2 = jax.random.uniform(kw2, (H, 1), jnp.float32, -lim2, lim2)
    b2 = jax.random.uniform(kb2, (1, 1), jnp.float32, -lim2, lim2)

    out = attention_module(x, w1, b1, w2, b2)
    out = jax.block_until_ready(out)

    ref = reference(x, w1, b1, w2, b2)
    assert out.shape == (B, 1), out.shape
    assert jnp.allclose(out, ref, atol=1e-5, rtol=1e-5), (out, ref)

    print("KERNEL_OK")
</pallas_src>

<mosaic_0001>
module attributes {stable_mosaic.version = 11 : i64} {
  func.func @_attention_kernel_fused(%arg0: i32, %arg1: memref<2x128xf32, #tpu.memory_space<vmem>>, %arg2: memref<128x32xf32, #tpu.memory_space<vmem>>, %arg3: memref<1x32xf32, #tpu.memory_space<vmem>>, %arg4: memref<1x32xf32, #tpu.memory_space<vmem>>, %arg5: memref<1x1xf32, #tpu.memory_space<smem>>, %arg6: memref<2x1xf32, #tpu.memory_space<vmem>>) attributes {dimension_semantics = [#tpu.dimension_semantics<parallel>], iteration_bounds = array<i64: 1>, scalar_prefetch = 0 : i64, scratch_operands = 0 : i64, tpu.core_type = #tpu.core_type<tc>, window_params = [{transform_indices = @transform_0, window_bounds = array<i64: 2, 128>}, {pipeline_mode = #tpu.pipeline_mode<synchronous>, transform_indices = @transform_1, window_bounds = array<i64: 128, 32>}, {pipeline_mode = #tpu.pipeline_mode<synchronous>, transform_indices = @transform_2, window_bounds = array<i64: 1, 32>}, {pipeline_mode = #tpu.pipeline_mode<synchronous>, transform_indices = @transform_3, window_bounds = array<i64: 1, 32>}, {transform_indices = @transform_4, window_bounds = array<i64: 1, 1>}, {transform_indices = @transform_5, window_bounds = array<i64: 2, 1>}]} {
    %c0 = arith.constant 0 : index
    %c0_0 = arith.constant 0 : index
    %0 = vector.load %arg1[%c0, %c0_0] : memref<2x128xf32, #tpu.memory_space<vmem>>, vector<2x128xf32>
    %c0_1 = arith.constant 0 : index
    %c0_2 = arith.constant 0 : index
    %1 = vector.load %arg2[%c0_1, %c0_2] : memref<128x32xf32, #tpu.memory_space<vmem>>, vector<128x32xf32>
    %cst = arith.constant dense<0.000000e+00> : vector<2x32xf32>
    %2 = tpu.matmul %0, %1, %cst {dimension_numbers = #tpu.dot_dimension_numbers<[1], [0], [0], [1], [0, 0, 1, 1], [], []>} : vector<2x128xf32>, vector<128x32xf32>, vector<2x32xf32> -> vector<2x32xf32>
    %c0_3 = arith.constant 0 : index
    %c0_4 = arith.constant 0 : index
    %3 = vector.load %arg3[%c0_3, %c0_4] : memref<1x32xf32, #tpu.memory_space<vmem>>, vector<1x32xf32>
    %4 = vector.broadcast %3 : vector<1x32xf32> to vector<2x32xf32>
    %5 = arith.addf %2, %4 : vector<2x32xf32>
    %cst_5 = arith.constant 0.000000e+00 : f32
    %6 = vector.broadcast %cst_5 : f32 to vector<2x32xf32>
    %7 = arith.maximumf %5, %6 : vector<2x32xf32>
    %c0_6 = arith.constant 0 : index
    %c0_7 = arith.constant 0 : index
    %8 = vector.load %arg4[%c0_6, %c0_7] : memref<1x32xf32, #tpu.memory_space<vmem>>, vector<1x32xf32>
    %9 = vector.broadcast %8 : vector<1x32xf32> to vector<2x32xf32>
    %10 = arith.mulf %7, %9 : vector<2x32xf32>
    %cst_8 = arith.constant dense<0.000000e+00> : vector<2xf32>
    %11 = vector.multi_reduction <add>, %10, %cst_8 [1] : vector<2x32xf32> to vector<2xf32>
    %12 = vector.shape_cast %11 : vector<2xf32> to vector<2x1xf32>
    %c0_9 = arith.constant 0 : index
    %c0_10 = arith.constant 0 : index
    %13 = memref.load %arg5[%c0_9, %c0_10] : memref<1x1xf32, #tpu.memory_space<smem>>
    %14 = vector.broadcast %13 : f32 to vector<2x1xf32>
    %15 = arith.addf %12, %14 : vector<2x1xf32>
    %cst_11 = arith.constant 0.000000e+00 : f32
    %16 = vector.broadcast %cst_11 : f32 to vector<2x1xf32>
    %17 = arith.subf %16, %15 : vector<2x1xf32>
    %18 = math.exp %17 : vector<2x1xf32>
    %cst_12 = arith.constant 1.000000e+00 : f32
    %19 = vector.broadcast %cst_12 : f32 to vector<2x1xf32>
    %20 = arith.addf %19, %18 : vector<2x1xf32>
    %cst_13 = arith.constant 1.000000e+00 : f32
    %21 = vector.broadcast %cst_13 : f32 to vector<2x1xf32>
    %22 = arith.divf %21, %20 : vector<2x1xf32>
    %c0_14 = arith.constant 0 : index
    %c0_15 = arith.constant 0 : index
    %23 = vector.load %arg6[%c0_14, %c0_15] : memref<2x1xf32, #tpu.memory_space<vmem>>, vector<2x1xf32>
    tpu.vector_store %arg6[%c0_14, %c0_15], %22 {strides = array<i32>} : memref<2x1xf32, #tpu.memory_space<vmem>>, vector<2x1xf32>,
    return
  }
  func.func @transform_0(%arg0: i32) -> (i32, i32) {
    %c0_i32 = arith.constant 0 : i32
    %c0_i32_0 = arith.constant 0 : i32
    return %arg0, %c0_i32 : i32, i32
  }
  func.func @transform_1(%arg0: i32) -> (i32, i32) {
    %c0_i32 = arith.constant 0 : i32
    %c0_i32_0 = arith.constant 0 : i32
    %c0_i32_1 = arith.constant 0 : i32
    return %c0_i32, %c0_i32_0 : i32, i32
  }
  func.func @transform_2(%arg0: i32) -> (i32, i32) {
    %c0_i32 = arith.constant 0 : i32
    %c0_i32_0 = arith.constant 0 : i32
    %c0_i32_1 = arith.constant 0 : i32
    return %c0_i32, %c0_i32_0 : i32, i32
  }
  func.func @transform_3(%arg0: i32) -> (i32, i32) {
    %c0_i32 = arith.constant 0 : i32
    %c0_i32_0 = arith.constant 0 : i32
    %c0_i32_1 = arith.constant 0 : i32
    return %c0_i32, %c0_i32_0 : i32, i32
  }
  func.func @transform_4(%arg0: i32) -> (i32, i32) {
    %c0_i32 = arith.constant 0 : i32
    %c0_i32_0 = arith.constant 0 : i32
    %c0_i32_1 = arith.constant 0 : i32
    return %c0_i32, %c0_i32_0 : i32, i32
  }
  func.func @transform_5(%arg0: i32) -> (i32, i32) {
    %c0_i32 = arith.constant 0 : i32
    %c0_i32_0 = arith.constant 0 : i32
    return %arg0, %c0_i32 : i32, i32
  }
}

</mosaic_0001>

<bundles_post_ra>
// kernel: tpu_custom_call.1
= control target key start
LH: loop header
LB: loop body
LE: loop exit
PB: predicated region body
PF: predicated region fallthrough
CT: control target
= control target key end

     0   :  { %v228_v0 = vmov 0.0|0.0   ;;  %vm229_vm0 = vmmov 0   ;;  %v230_v4 = vmov 0.0   ;;  %vm124_vm1 = vcmask 254976   ;;  %s324_s1 = inlined_call_operand.vmem [shape: f32[128,32], index: 1, kind: input, shape index: {}]   ;;  %s325_s0 = inlined_call_operand.vmem [shape: f32[2,128], index: 0, kind: input, shape index: {}]   ;;  %s326_s2 = inlined_call_operand.vmem [shape: f32[1,32], index: 2, kind: input, shape index: {}]   ;;  %s327_s3 = inlined_call_operand.vmem [shape: f32[1,32], index: 3, kind: input, shape index: {}]   ;;  %s328_s4 = inlined_call_operand.<no memory space> [shape: f32[1,1], index: 4, kind: input, shape index: {}]   ;;  %s329_s5 = inlined_call_operand.vmem [shape: f32[2,1], index: 5, kind: output, shape index: {}]  }
   0x1   :  { %197 = vmatprep.subr.bf16.mxu0 %v228_v0  ;;  %v22_v1 = vld [vmem:[%s324_s1] sm:$0xff]  ;;  %v23_v2 = vld [vmem:[%s324_s1 + $0x8] sm:$0xff]  ;;  %v24_v3 = vld [vmem:[%s324_s1 + $0x10] sm:$0xff]  ;;  %194 = vmatprep.mubr.msk.f32.mxu0 %vm229_vm0, %v230_v4  ;;  %v129_v35 = vstv %s328_s4  ;;  %vm137_vm2 = vcmask 1024  }
   0x2   :  { %v198_v5 = vpack.c.bf16 %v23_v2, %v22_v1  ;;  %v25_v6 = vld [vmem:[%s324_s1 + $0x18] sm:$0xff]  ;;  %v26_v8 = vld [vmem:[%s324_s1 + $0x20] sm:$0xff]  ;;  %v27_v9 = vld [vmem:[%s324_s1 + $0x28] sm:$0xff] }
   0x3   :  { %v201_v7 = vpack.c.bf16 %v25_v6, %v24_v3  ;;  %v204_v10 = vpack.c.bf16 %v27_v9, %v26_v8  ;;  %v28_v11 = vld [vmem:[%s324_s1 + $0x30] sm:$0xff]  ;;  %v29_v12 = vld [vmem:[%s324_s1 + $0x38] sm:$0xff]  ;;  %v30_v14 = vld [vmem:[%s324_s1 + $0x40] sm:$0xff] }
   0x4   :  { %199 = vmatpush3.bf16.msra.mxu0 %v198_v5  ;;  %v207_v13 = vpack.c.bf16 %v29_v12, %v28_v11  ;;  %v31_v15 = vld [vmem:[%s324_s1 + $0x48] sm:$0xff]  ;;  %v32_v17 = vld [vmem:[%s324_s1 + $0x50] sm:$0xff]  ;;  %v33_v18 = vld [vmem:[%s324_s1 + $0x58] sm:$0xff] }
   0x5   :  { %200 = vmatprep.subr.bf16.mxu0 %v228_v0  ;;  %v210_v16 = vpack.c.bf16 %v31_v15, %v30_v14  ;;  %v213_v19 = vpack.c.bf16 %v33_v18, %v32_v17  ;;  %v34_v20 = vld [vmem:[%s324_s1 + $0x60] sm:$0xff]  ;;  %v35_v21 = vld [vmem:[%s324_s1 + $0x68] sm:$0xff]  ;;  %v36_v23 = vld [vmem:[%s324_s1 + $0x70] sm:$0xff] }
   0x6   :  { %v216_v22 = vpack.c.bf16 %v35_v21, %v34_v20  ;;  %v37_v24 = vld [vmem:[%s324_s1 + $0x78] sm:$0xff]  ;;  %v21_v26 = vld [vmem:[%s325_s0] sm:$0x3] }
   0x7   :  { %v219_v25 = vpack.c.bf16 %v37_v24, %v36_v23  ;;  %v143_v27 = vld [vmem:[%s326_s2] ss:$0 sm:$0xff] }
   0x8   :  { %202 = vmatpush3.bf16.msra.mxu0 %v201_v7  ;;  %v144_v31 = vld [vmem:[%s327_s3] ss:$0 sm:$0xff] }
   0x9   :  { %203 = vmatprep.subr.bf16.mxu0 %v228_v0 }
   0xc   :  { %205 = vmatpush3.bf16.msra.mxu0 %v204_v10 }
   0xd   :  { %206 = vmatprep.subr.bf16.mxu0 %v228_v0 }
  0x10   :  { %208 = vmatpush3.bf16.msra.mxu0 %v207_v13 }
  0x11   :  { %209 = vmatprep.subr.bf16.mxu0 %v228_v0 }
  0x14   :  { %211 = vmatpush3.bf16.msra.mxu0 %v210_v16 }
  0x15   :  { %212 = vmatprep.subr.bf16.mxu0 %v228_v0 }
  0x18   :  { %214 = vmatpush3.bf16.msra.mxu0 %v213_v19 }
  0x19   :  { %215 = vmatprep.subr.bf16.mxu0 %v228_v0 }
  0x1c   :  { %217 = vmatpush3.bf16.msra.mxu0 %v216_v22 }
  0x1d   :  { %218 = vmatprep.subr.bf16.mxu0 %v228_v0 }
  0x20   :  { %220 = vmatpush3.bf16.msra.mxu0 %v219_v25 }
  0x23   :  { %195 = vmatmul.mubr.f32.vlgmr.msra.gmra.mrb[0].mxu0 %v21_v26 }
  0xf6   :  { %v111_v28 = vpop.f32.mrb[0].mxu0 }
  0xf7   :  { %v112_v29 = vadd.f32 %v143_v27, %v111_v28  ;;  %v196_v30 = vpop.f32.mrb[1].mxu0 }
  0xf9   :  { %v115_v32 = vmax.f32 %v112_v29, 0.0 }
  0xfb   :  { %v123_v33 = vmul.f32 %v144_v31, %v115_v32 }
  0xfd   :  { %v125_v34 = vsel %vm124_vm1, %v123_v33, 0.0 }
  0xfe   :  { %126 = vadd.xlane.f32.xlu0 %v125_v34 }
 0x18b   :  { %v127_v36 = vpop.xlane.xlu0 %126 }
 0x18c   :  { %v130_v37 = vadd.f32 %v129_v35, %v127_v36 }
 0x18e   :  { %v131_v38 = vsub.f32 0.0, %v130_v37 }
 0x190   :  { %v132_v39 = vmul.f32 1.442695, %v131_v38 }
 0x192   :  { %224 = vpow2.f32 %v132_v39 }
 0x19c   :  { %v225_v40 = vpop.eup %224 }
 0x19d   :  { %v134_v41 = vadd.f32 1.0, %v225_v40 }
 0x19f   :  { %226 = vrcp.f32 %v134_v41 }
 0x1a9   :  { %v227_v42 = vpop.eup %226 }
 0x1aa   :  { %138 = vst.msk [vmem:[%s329_s5] sm:$0x3] %vm137_vm2, %v227_v42 }

</bundles_post_ra>
